<compile_context>
chip_gen: v7x
topology: tpu7x:2x2x1
jax: 0.10.0
libtpu: 0.0.40
codegen_flags: <defaults>
</compile_context>

<pallas_src>
import math
import functools

import jax
import jax.numpy as jnp
from jax import lax
from jax.experimental import pallas as pl
from jax.experimental.pallas import tpu as pltpu


def _mha_kernel(valid_lens_ref,                    # scalar-prefetch: (B,) int32 in SMEM
                x_ref, y_ref,                      # (1, Tq, H) f32, (1, Tk, H) f32
                wq_ref, wk_ref, wv_ref, wo_ref,    # (H, H) bf16, (in, out) layout
                o_ref,                             # (1, Tq, H) f32
                *, num_heads: int):
    b = pl.program_id(0)
    vl = valid_lens_ref[b]                         # scalar valid length for this batch row

    x = x_ref[0].astype(jnp.bfloat16)              # (Tq, H)
    y = y_ref[0].astype(jnp.bfloat16)              # (Tk, H)

    # ---- Q/K/V projections: bf16 operands, f32 accumulation, full N=H width on the MXU.
    q = jnp.dot(x, wq_ref[...], preferred_element_type=jnp.float32)   # (Tq, H) f32
    k = jnp.dot(y, wk_ref[...], preferred_element_type=jnp.float32)   # (Tk, H) f32
    v = jnp.dot(y, wv_ref[...], preferred_element_type=jnp.float32)   # (Tk, H) f32

    Tq, H = q.shape
    Tk = k.shape[0]
    d = H // num_heads
    scale = 1.0 / math.sqrt(d)

    # ---- pack heads once into a single batched operand: (num_heads, T, d), bf16.
    qh = jnp.stack([q[:, h * d:(h + 1) * d] for h in range(num_heads)], axis=0).astype(jnp.bfloat16)
    kh = jnp.stack([k[:, h * d:(h + 1) * d] for h in range(num_heads)], axis=0).astype(jnp.bfloat16)
    vh = jnp.stack([v[:, h * d:(h + 1) * d] for h in range(num_heads)], axis=0).astype(jnp.bfloat16)

    # ---- scores for ALL heads in one batched contraction (contracts d directly: no kh.T).
    scores = jnp.einsum('hqd,hkd->hqk', qh, kh,
                        preferred_element_type=jnp.float32) * scale    # (nh, Tq, Tk) f32

    # ---- d2l masked_softmax: mask built once, broadcast over the head axis, f32 math.
    col = lax.broadcasted_iota(jnp.int32, (Tq, Tk), 1)
    scores = jnp.where(col < vl, scores, jnp.float32(-1e6))

    m = jnp.max(scores, axis=-1, keepdims=True)
    p = jnp.exp(scores - m)
    attn = p * pl.reciprocal(jnp.sum(p, axis=-1, keepdims=True), approx=True)

    # ---- attention-weighted values, all heads at once.
    ctx = jnp.einsum('hqk,hkd->hqd', attn.astype(jnp.bfloat16), vh,
                     preferred_element_type=jnp.float32)               # (nh, Tq, d) f32

    # ---- merge heads and do the output projection as ONE full-K (K=H) matmul.
    ctx16 = ctx.astype(jnp.bfloat16)
    concat = jnp.concatenate([ctx16[h] for h in range(num_heads)], axis=-1)   # (Tq, H)
    o_ref[0] = jnp.dot(concat, wo_ref[...],
                       preferred_element_type=jnp.float32).astype(o_ref.dtype)


def multihead_attention(x, y, valid_lens, wq, wk, wv, wo, *, num_heads):
    """x: (B, Tq, H), y: (B, Tk, H), valid_lens: (B,) int,
    wq/wk/wv/wo: (H, H) stored as (in, out).  Returns (B, Tq, H) float32."""
    B, Tq, H = x.shape
    _, Tk, _ = y.shape

    kernel = functools.partial(_mha_kernel, num_heads=num_heads)

    # Ship weights to the kernel in bf16 (half the DMA bytes / VMEM; f32 accumulation
    # happens inside the kernel).
    wq_b = wq.astype(jnp.bfloat16)
    wk_b = wk.astype(jnp.bfloat16)
    wv_b = wv.astype(jnp.bfloat16)
    wo_b = wo.astype(jnp.bfloat16)

    grid_spec = pltpu.PrefetchScalarGridSpec(
        num_scalar_prefetch=1,
        grid=(B,),
        in_specs=[
            pl.BlockSpec((1, Tq, H), lambda b, vl: (b, 0, 0)),   # x
            pl.BlockSpec((1, Tk, H), lambda b, vl: (b, 0, 0)),   # y
            pl.BlockSpec((H, H), lambda b, vl: (0, 0)),          # wq (constant block)
            pl.BlockSpec((H, H), lambda b, vl: (0, 0)),          # wk
            pl.BlockSpec((H, H), lambda b, vl: (0, 0)),          # wv
            pl.BlockSpec((H, H), lambda b, vl: (0, 0)),          # wo
        ],
        out_specs=pl.BlockSpec((1, Tq, H), lambda b, vl: (b, 0, 0)),
    )

    return pl.pallas_call(
        kernel,
        out_shape=jax.ShapeDtypeStruct((B, Tq, H), jnp.float32),
        grid_spec=grid_spec,
        compiler_params=pltpu.CompilerParams(
            dimension_semantics=("parallel",),         # batch steps are independent
            vmem_limit_bytes=32 * 1024 * 1024,         # re-derive / shrink blocks for large H on v7x
        ),
    )(valid_lens.astype(jnp.int32), x, y, wq_b, wk_b, wv_b, wo_b)


def _reference(x, y, valid_lens, wq, wk, wv, wo, num_heads):
    """Pure-JAX f32 reference mirroring the PyTorch module exactly."""
    B, Tq, H = x.shape
    Tk = y.shape[1]
    d = H // num_heads

    def split(t):  # transpose_qkv
        t = t.reshape(t.shape[0], t.shape[1], num_heads, -1)
        t = jnp.transpose(t, (0, 2, 1, 3))
        return t.reshape(-1, t.shape[2], t.shape[3])

    q = split(x @ wq)
    k = split(y @ wk)
    v = split(y @ wv)
    vl = jnp.repeat(valid_lens, num_heads, axis=0)          # (B*nh,)

    scores = jnp.einsum('bqd,bkd->bqk', q, k) / math.sqrt(d)
    col = jnp.arange(Tk)[None, None, :]
    scores = jnp.where(col < vl[:, None, None], scores, -1e6)
    attn = jax.nn.softmax(scores, axis=-1)
    out = jnp.einsum('bqk,bkd->bqd', attn, v)               # (B*nh, Tq, d)

    out = out.reshape(-1, num_heads, Tq, d)                 # transpose_output
    out = jnp.transpose(out, (0, 2, 1, 3)).reshape(B, Tq, H)
    return out @ wo


def _kaiming_uniform(key, fan_in, fan_out):
    # torch.nn.init.kaiming_uniform_ (a=0, fan_in, leaky_relu): bound = sqrt(6/fan_in).
    bound = math.sqrt(6.0 / fan_in)
    # returned in (in, out) layout so forward is x @ W
    return jax.random.uniform(key, (fan_in, fan_out), jnp.float32, -bound, bound)


if __name__ == "__main__":
    batch_size = 2
    num_queries = 4
    num_kvpairs = 6
    num_hiddens = 32
    num_heads = 4

    root = jax.random.PRNGKey(0)
    kx, ky, kq, kk, kv, ko = jax.random.split(root, 6)

    X = jax.random.normal(kx, (batch_size, num_queries, num_hiddens), jnp.float32)
    Y = jax.random.normal(ky, (batch_size, num_kvpairs, num_hiddens), jnp.float32)
    valid_lens = jnp.array([3, 2], dtype=jnp.int32)

    Wq = _kaiming_uniform(kq, num_hiddens, num_hiddens)
    Wk = _kaiming_uniform(kk, num_hiddens, num_hiddens)
    Wv = _kaiming_uniform(kv, num_hiddens, num_hiddens)
    Wo = _kaiming_uniform(ko, num_hiddens, num_hiddens)

    out = multihead_attention(X, Y, valid_lens, Wq, Wk, Wv, Wo, num_heads=num_heads)
    out = jax.block_until_ready(out)

    ref = _reference(X, Y, valid_lens, Wq, Wk, Wv, Wo, num_heads)
    assert out.shape == (batch_size, num_queries, num_hiddens)
    # Kernel uses bf16 matmul operands + approx reciprocal; compare against the f32
    # reference with a scale-normalized max error instead of tight elementwise allclose.
    err = float(jnp.max(jnp.abs(out - ref)) / (jnp.max(jnp.abs(ref)) + 1e-6))
    assert err < 5e-2, f"mismatch vs reference: normalized max err {err:.3e}"

    print("KERNEL_OK")
</pallas_src>

<mosaic_0001>
module attributes {stable_mosaic.version = 11 : i64} {
  func.func @_mha_kernel(%arg0: i32, %arg1: memref<2xi32, #tpu.memory_space<smem>>, %arg2: memref<1x4x32xf32, #tpu.memory_space<vmem>>, %arg3: memref<1x6x32xf32, #tpu.memory_space<vmem>>, %arg4: memref<32x32xbf16, #tpu.memory_space<vmem>>, %arg5: memref<32x32xbf16, #tpu.memory_space<vmem>>, %arg6: memref<32x32xbf16, #tpu.memory_space<vmem>>, %arg7: memref<32x32xbf16, #tpu.memory_space<vmem>>, %arg8: memref<1x4x32xf32, #tpu.memory_space<vmem>>) attributes {dimension_semantics = [#tpu.dimension_semantics<parallel>], iteration_bounds = array<i64: 2>, scalar_prefetch = 1 : i64, scratch_operands = 0 : i64, tpu.core_type = #tpu.core_type<tc>, window_params = [{transform_indices = @transform_0, window_bounds = array<i64: 1, 4, 32>}, {transform_indices = @transform_1, window_bounds = array<i64: 1, 6, 32>}, {pipeline_mode = #tpu.pipeline_mode<synchronous>, transform_indices = @transform_2, window_bounds = array<i64: 32, 32>}, {pipeline_mode = #tpu.pipeline_mode<synchronous>, transform_indices = @transform_3, window_bounds = array<i64: 32, 32>}, {pipeline_mode = #tpu.pipeline_mode<synchronous>, transform_indices = @transform_4, window_bounds = array<i64: 32, 32>}, {pipeline_mode = #tpu.pipeline_mode<synchronous>, transform_indices = @transform_5, window_bounds = array<i64: 32, 32>}, {transform_indices = @transform_6, window_bounds = array<i64: 1, 4, 32>}]} {
    %0 = arith.index_cast %arg0 : i32 to index
    %1 = memref.load %arg1[%0] : memref<2xi32, #tpu.memory_space<smem>>
    %c0 = arith.constant 0 : index
    %c0_0 = arith.constant 0 : index
    %c0_1 = arith.constant 0 : index
    %2 = vector.load %arg2[%c0, %c0_0, %c0_1] : memref<1x4x32xf32, #tpu.memory_space<vmem>>, vector<1x4x32xf32>
    %3 = vector.shape_cast %2 : vector<1x4x32xf32> to vector<4x32xf32>
    %4 = arith.truncf %3 : vector<4x32xf32> to vector<4x32xbf16>
    %c0_2 = arith.constant 0 : index
    %c0_3 = arith.constant 0 : index
    %c0_4 = arith.constant 0 : index
    %5 = vector.load %arg3[%c0_2, %c0_3, %c0_4] : memref<1x6x32xf32, #tpu.memory_space<vmem>>, vector<1x6x32xf32>
    %6 = vector.shape_cast %5 : vector<1x6x32xf32> to vector<6x32xf32>
    %7 = arith.truncf %6 : vector<6x32xf32> to vector<6x32xbf16>
    %c0_5 = arith.constant 0 : index
    %c0_6 = arith.constant 0 : index
    %8 = vector.load %arg4[%c0_5, %c0_6] : memref<32x32xbf16, #tpu.memory_space<vmem>>, vector<32x32xbf16>
    %cst = arith.constant dense<0.000000e+00> : vector<4x32xf32>
    %9 = tpu.matmul %4, %8, %cst {dimension_numbers = #tpu.dot_dimension_numbers<[1], [0], [0], [1], [0, 0, 1, 1], [], []>} : vector<4x32xbf16>, vector<32x32xbf16>, vector<4x32xf32> -> vector<4x32xf32>
    %c0_7 = arith.constant 0 : index
    %c0_8 = arith.constant 0 : index
    %10 = vector.load %arg5[%c0_7, %c0_8] : memref<32x32xbf16, #tpu.memory_space<vmem>>, vector<32x32xbf16>
    %cst_9 = arith.constant dense<0.000000e+00> : vector<6x32xf32>
    %11 = tpu.matmul %7, %10, %cst_9 {dimension_numbers = #tpu.dot_dimension_numbers<[1], [0], [0], [1], [0, 0, 1, 1], [], []>} : vector<6x32xbf16>, vector<32x32xbf16>, vector<6x32xf32> -> vector<6x32xf32>
    %c0_10 = arith.constant 0 : index
    %c0_11 = arith.constant 0 : index
    %12 = vector.load %arg6[%c0_10, %c0_11] : memref<32x32xbf16, #tpu.memory_space<vmem>>, vector<32x32xbf16>
    %cst_12 = arith.constant dense<0.000000e+00> : vector<6x32xf32>
    %13 = tpu.matmul %7, %12, %cst_12 {dimension_numbers = #tpu.dot_dimension_numbers<[1], [0], [0], [1], [0, 0, 1, 1], [], []>} : vector<6x32xbf16>, vector<32x32xbf16>, vector<6x32xf32> -> vector<6x32xf32>
    %14 = vector.extract_strided_slice %9 {offsets = [0, 0], sizes = [4, 8], strides = [1, 1]} : vector<4x32xf32> to vector<4x8xf32>
    %15 = vector.extract_strided_slice %9 {offsets = [0, 8], sizes = [4, 8], strides = [1, 1]} : vector<4x32xf32> to vector<4x8xf32>
    %16 = vector.extract_strided_slice %9 {offsets = [0, 16], sizes = [4, 8], strides = [1, 1]} : vector<4x32xf32> to vector<4x8xf32>
    %17 = vector.extract_strided_slice %9 {offsets = [0, 24], sizes = [4, 8], strides = [1, 1]} : vector<4x32xf32> to vector<4x8xf32>
    %18 = vector.shape_cast %14 : vector<4x8xf32> to vector<1x4x8xf32>
    %19 = vector.shape_cast %15 : vector<4x8xf32> to vector<1x4x8xf32>
    %20 = vector.shape_cast %16 : vector<4x8xf32> to vector<1x4x8xf32>
    %21 = vector.shape_cast %17 : vector<4x8xf32> to vector<1x4x8xf32>
    %22 = tpu.concatenate %18, %19, %20, %21 in 0 : vector<1x4x8xf32>, vector<1x4x8xf32>, vector<1x4x8xf32>, vector<1x4x8xf32> -> vector<4x4x8xf32>
    %23 = arith.truncf %22 : vector<4x4x8xf32> to vector<4x4x8xbf16>
    %24 = vector.extract_strided_slice %11 {offsets = [0, 0], sizes = [6, 8], strides = [1, 1]} : vector<6x32xf32> to vector<6x8xf32>
    %25 = vector.extract_strided_slice %11 {offsets = [0, 8], sizes = [6, 8], strides = [1, 1]} : vector<6x32xf32> to vector<6x8xf32>
    %26 = vector.extract_strided_slice %11 {offsets = [0, 16], sizes = [6, 8], strides = [1, 1]} : vector<6x32xf32> to vector<6x8xf32>
    %27 = vector.extract_strided_slice %11 {offsets = [0, 24], sizes = [6, 8], strides = [1, 1]} : vector<6x32xf32> to vector<6x8xf32>
    %28 = vector.shape_cast %24 : vector<6x8xf32> to vector<1x6x8xf32>
    %29 = vector.shape_cast %25 : vector<6x8xf32> to vector<1x6x8xf32>
    %30 = vector.shape_cast %26 : vector<6x8xf32> to vector<1x6x8xf32>
    %31 = vector.shape_cast %27 : vector<6x8xf32> to vector<1x6x8xf32>
    %32 = tpu.concatenate %28, %29, %30, %31 in 0 : vector<1x6x8xf32>, vector<1x6x8xf32>, vector<1x6x8xf32>, vector<1x6x8xf32> -> vector<4x6x8xf32>
    %33 = arith.truncf %32 : vector<4x6x8xf32> to vector<4x6x8xbf16>
    %34 = vector.extract_strided_slice %13 {offsets = [0, 0], sizes = [6, 8], strides = [1, 1]} : vector<6x32xf32> to vector<6x8xf32>
    %35 = vector.extract_strided_slice %13 {offsets = [0, 8], sizes = [6, 8], strides = [1, 1]} : vector<6x32xf32> to vector<6x8xf32>
    %36 = vector.extract_strided_slice %13 {offsets = [0, 16], sizes = [6, 8], strides = [1, 1]} : vector<6x32xf32> to vector<6x8xf32>
    %37 = vector.extract_strided_slice %13 {offsets = [0, 24], sizes = [6, 8], strides = [1, 1]} : vector<6x32xf32> to vector<6x8xf32>
    %38 = vector.shape_cast %34 : vector<6x8xf32> to vector<1x6x8xf32>
    %39 = vector.shape_cast %35 : vector<6x8xf32> to vector<1x6x8xf32>
    %40 = vector.shape_cast %36 : vector<6x8xf32> to vector<1x6x8xf32>
    %41 = vector.shape_cast %37 : vector<6x8xf32> to vector<1x6x8xf32>
    %42 = tpu.concatenate %38, %39, %40, %41 in 0 : vector<1x6x8xf32>, vector<1x6x8xf32>, vector<1x6x8xf32>, vector<1x6x8xf32> -> vector<4x6x8xf32>
    %43 = arith.truncf %42 : vector<4x6x8xf32> to vector<4x6x8xbf16>
    "tpu.trace_start"() <{level = 10 : i32, message = "hqd,hkd->hqk"}> : () -> ()
    %cst_13 = arith.constant dense<0.000000e+00> : vector<4x4x6xf32>
    %44 = tpu.matmul %23, %33, %cst_13 {dimension_numbers = #tpu.dot_dimension_numbers<[2], [2], [1], [1], [0, 0, 0, 1, 1, 1], [0], [0]>} : vector<4x4x8xbf16>, vector<4x6x8xbf16>, vector<4x4x6xf32> -> vector<4x4x6xf32>
    "tpu.trace_stop"() : () -> ()
    %cst_14 = arith.constant 0.353553385 : f32
    %45 = vector.broadcast %cst_14 : f32 to vector<4x4x6xf32>
    %46 = arith.mulf %44, %45 : vector<4x4x6xf32>
    %47 = tpu.iota {dimensions = array<i32: 1>} : vector<4x6xi32>
    %48 = vector.broadcast %1 : i32 to vector<4x6xi32>
    %49 = arith.cmpi slt, %47, %48 : vector<4x6xi32>
    %cst_15 = arith.constant -1.000000e+06 : f32
    %50 = vector.shape_cast %49 : vector<4x6xi1> to vector<1x4x6xi1>
    %51 = vector.broadcast %50 : vector<1x4x6xi1> to vector<4x4x6xi1>
    %52 = vector.broadcast %cst_15 : f32 to vector<4x4x6xf32>
    %53 = arith.select %51, %46, %52 : vector<4x4x6xi1>, vector<4x4x6xf32>
    %cst_16 = arith.constant dense<0xFF800000> : vector<4x4xf32>
    %54 = vector.multi_reduction <maximumf>, %53, %cst_16 [2] : vector<4x4x6xf32> to vector<4x4xf32>
    %55 = vector.shape_cast %54 : vector<4x4xf32> to vector<4x4x1xf32>
    %56 = vector.broadcast %55 : vector<4x4x1xf32> to vector<4x4x6xf32>
    %57 = arith.subf %53, %56 : vector<4x4x6xf32>
    %58 = math.exp %57 : vector<4x4x6xf32>
    %cst_17 = arith.constant dense<0.000000e+00> : vector<4x4xf32>
    %59 = vector.multi_reduction <add>, %58, %cst_17 [2] : vector<4x4x6xf32> to vector<4x4xf32>
    %60 = vector.shape_cast %59 : vector<4x4xf32> to vector<4x4x1xf32>
    %61 = tpu.reciprocal %60 {approx = true} : vector<4x4x1xf32> -> vector<4x4x1xf32>
    %62 = vector.broadcast %61 : vector<4x4x1xf32> to vector<4x4x6xf32>
    %63 = arith.mulf %58, %62 : vector<4x4x6xf32>
    %64 = arith.truncf %63 : vector<4x4x6xf32> to vector<4x4x6xbf16>
    "tpu.trace_start"() <{level = 10 : i32, message = "hqk,hkd->hqd"}> : () -> ()
    %cst_18 = arith.constant dense<0.000000e+00> : vector<4x4x8xf32>
    %65 = tpu.matmul %64, %43, %cst_18 {dimension_numbers = #tpu.dot_dimension_numbers<[2], [1], [1], [2], [0, 0, 0, 1, 1, 2], [0], [0]>} : vector<4x4x6xbf16>, vector<4x6x8xbf16>, vector<4x4x8xf32> -> vector<4x4x8xf32>
    "tpu.trace_stop"() : () -> ()
    %66 = arith.truncf %65 : vector<4x4x8xf32> to vector<4x4x8xbf16>
    %67 = vector.extract_strided_slice %66 {offsets = [0, 0, 0], sizes = [1, 4, 8], strides = [1, 1, 1]} : vector<4x4x8xbf16> to vector<1x4x8xbf16>
    %68 = vector.shape_cast %67 : vector<1x4x8xbf16> to vector<4x8xbf16>
    %69 = vector.extract_strided_slice %66 {offsets = [1, 0, 0], sizes = [1, 4, 8], strides = [1, 1, 1]} : vector<4x4x8xbf16> to vector<1x4x8xbf16>
    %70 = vector.shape_cast %69 : vector<1x4x8xbf16> to vector<4x8xbf16>
    %71 = vector.extract_strided_slice %66 {offsets = [2, 0, 0], sizes = [1, 4, 8], strides = [1, 1, 1]} : vector<4x4x8xbf16> to vector<1x4x8xbf16>
    %72 = vector.shape_cast %71 : vector<1x4x8xbf16> to vector<4x8xbf16>
    %73 = vector.extract_strided_slice %66 {offsets = [3, 0, 0], sizes = [1, 4, 8], strides = [1, 1, 1]} : vector<4x4x8xbf16> to vector<1x4x8xbf16>
    %74 = vector.shape_cast %73 : vector<1x4x8xbf16> to vector<4x8xbf16>
    %75 = tpu.concatenate %68, %70, %72, %74 in 1 : vector<4x8xbf16>, vector<4x8xbf16>, vector<4x8xbf16>, vector<4x8xbf16> -> vector<4x32xbf16>
    %c0_19 = arith.constant 0 : index
    %c0_20 = arith.constant 0 : index
    %76 = vector.load %arg7[%c0_19, %c0_20] : memref<32x32xbf16, #tpu.memory_space<vmem>>, vector<32x32xbf16>
    %cst_21 = arith.constant dense<0.000000e+00> : vector<4x32xf32>
    %77 = tpu.matmul %75, %76, %cst_21 {dimension_numbers = #tpu.dot_dimension_numbers<[1], [0], [0], [1], [0, 0, 1, 1], [], []>} : vector<4x32xbf16>, vector<32x32xbf16>, vector<4x32xf32> -> vector<4x32xf32>
    %c0_22 = arith.constant 0 : index
    %c0_23 = arith.constant 0 : index
    %c0_24 = arith.constant 0 : index
    %78 = vector.load %arg8[%c0_22, %c0_23, %c0_24] : memref<1x4x32xf32, #tpu.memory_space<vmem>>, vector<1x4x32xf32>
    %79 = vector.shape_cast %78 : vector<1x4x32xf32> to vector<4x32xf32>
    %80 = vector.shape_cast %77 : vector<4x32xf32> to vector<1x4x32xf32>
    tpu.vector_store %arg8[%c0_22, %c0_23, %c0_24], %80 {strides = array<i32>} : memref<1x4x32xf32, #tpu.memory_space<vmem>>, vector<1x4x32xf32>,
    return
  }
  func.func @transform_0(%arg0: i32, %arg1: memref<2xi32, #tpu.memory_space<smem>>) -> (i32, i32, i32) {
    %c0_i32 = arith.constant 0 : i32
    %c0_i32_0 = arith.constant 0 : i32
    %c0_i32_1 = arith.constant 0 : i32
    return %arg0, %c0_i32, %c0_i32_0 : i32, i32, i32
  }
  func.func @transform_1(%arg0: i32, %arg1: memref<2xi32, #tpu.memory_space<smem>>) -> (i32, i32, i32) {
    %c0_i32 = arith.constant 0 : i32
    %c0_i32_0 = arith.constant 0 : i32
    %c0_i32_1 = arith.constant 0 : i32
    return %arg0, %c0_i32, %c0_i32_0 : i32, i32, i32
  }
  func.func @transform_2(%arg0: i32, %arg1: memref<2xi32, #tpu.memory_space<smem>>) -> (i32, i32) {
    %c0_i32 = arith.constant 0 : i32
    %c0_i32_0 = arith.constant 0 : i32
    %c0_i32_1 = arith.constant 0 : i32
    return %c0_i32, %c0_i32_0 : i32, i32
  }
  func.func @transform_3(%arg0: i32, %arg1: memref<2xi32, #tpu.memory_space<smem>>) -> (i32, i32) {
    %c0_i32 = arith.constant 0 : i32
    %c0_i32_0 = arith.constant 0 : i32
    %c0_i32_1 = arith.constant 0 : i32
    return %c0_i32, %c0_i32_0 : i32, i32
  }
  func.func @transform_4(%arg0: i32, %arg1: memref<2xi32, #tpu.memory_space<smem>>) -> (i32, i32) {
    %c0_i32 = arith.constant 0 : i32
    %c0_i32_0 = arith.constant 0 : i32
    %c0_i32_1 = arith.constant 0 : i32
    return %c0_i32, %c0_i32_0 : i32, i32
  }
  func.func @transform_5(%arg0: i32, %arg1: memref<2xi32, #tpu.memory_space<smem>>) -> (i32, i32) {
    %c0_i32 = arith.constant 0 : i32
    %c0_i32_0 = arith.constant 0 : i32
    %c0_i32_1 = arith.constant 0 : i32
    return %c0_i32, %c0_i32_0 : i32, i32
  }
  func.func @transform_6(%arg0: i32, %arg1: memref<2xi32, #tpu.memory_space<smem>>) -> (i32, i32, i32) {
    %c0_i32 = arith.constant 0 : i32
    %c0_i32_0 = arith.constant 0 : i32
    %c0_i32_1 = arith.constant 0 : i32
    return %arg0, %c0_i32, %c0_i32_0 : i32, i32, i32
  }
}

</mosaic_0001>

<bundles_post_ra>
// kernel: tpu_custom_call.1
= control target key start
LH: loop header
LB: loop body
LE: loop exit
PB: predicated region body
PF: predicated region fallthrough
CT: control target
= control target key end

     0   :  { %s1908_s0 = inlined_call_operand.vmem [shape: s32[2], index: 0, kind: input, shape index: {}]   ;;  %s1909_s1 = inlined_call_operand.hbm [shape: f32[2,4,32], index: 1, kind: input, shape index: {}]   ;;  %s1910_s2 = inlined_call_operand.vmem [shape: f32[2,6,32], index: 2, kind: input, shape index: {}]   ;;  %s1911_s3 = inlined_call_operand.vmem [shape: bf16[32,32], index: 3, kind: input, shape index: {}]   ;;  %s1912_s4 = inlined_call_operand.vmem [shape: bf16[32,32], index: 4, kind: input, shape index: {}]   ;;  %s1913_s5 = inlined_call_operand.hbm [shape: bf16[32,32], index: 5, kind: input, shape index: {}]   ;;  %s1914_s6 = inlined_call_operand.vmem [shape: bf16[32,32], index: 6, kind: input, shape index: {}]   ;;  %s1915_s7 = inlined_call_operand.hbm [shape: f32[2,4,32], index: 7, kind: output, shape index: {}]  }
   0x1   :  { %s12_s26 = sshll.u32 %s1908_s0, 4  ;;  %s13_s26 = int_to_ptr.vmem [resolvable:$true] %s12_s26 }
   0x2   :  { %s1386_s27 = scalar_lea.vmem %s13_s26, 16  ;;  %p1391_p1 = scmp.lt.s32.totalorder %s13_s26, %s13_s26 }
   0x3   :  { %p1387_p0 = scmp.ne.s32.totalorder %s13_s26, %s1386_s27  ;;  %p1392_p2 = scmp.lt.s32.totalorder %s1386_s27, %s1386_s27 }
   0x5   :  { %p1393_p3 = por %p1392_p2, %p1391_p1 }
   0x7   :  { %p1394_p4 = pnand %p1393_p3, %p1387_p0 }
   0x9   :  { %1397 = shalt.err (!%p1394_p4)  }
   0xa   :  { %s1530_s28 = smov [#allocation3]  }
   0xb   :  { %15 = dma.vmem_to_smem %s13_s26, 16, %s1530_s28, [#allocation2] }
   0xc   :  { %1500 = dma.done.wait [#allocation2], 16 }
   0xd   :  { %1501 = vsyncadd [#allocation2], 4294967280 }
   0xe   :  { %17 = sfence }
   0xf   :  { %18 = vsyncpa [#allocation5], 0 }
  0x10   :  { %20 = vsyncpa [#allocation5 + $0x1], 0 }
  0x11   :  { %21 = vsyncpa [#allocation8], 0 }
  0x12   :  { %22 = vsyncpa [#allocation6], 0 }
  0x13   :  { %24 = vsyncpa [#allocation6 + $0x1], 0  ;;  %s1587_s29 = smov 0   ;;  %s1589_s0 = smov 0  }
  0x14   :  { %s1591_s30 = smov 0   ;;  %s1593_s8 = smov 0  }
  0x15 LB: > { %s1608_s9 = sadd.s32 4294967295, %s1528_s8   ;;  %s1151_s10 = sadd.s32 4294967294, %s1528_s8   ;;  %s1528_s8 = sphi %s1593_s8, %s1937_s8   ;;  %s1524_s30 = sphi %s1591_s30, %s1936_s30   ;;  %s1520_s0 = sphi %s1589_s0, %s1935_s0   ;;  %s1516_s29 = sphi %s1587_s29, %s1934_s29  }
  0x16   : > { %p50_p5 = scmp.ne.s32.totalorder %s1520_s0, %s1516_s29  ;;  %p1916_p6 = scmp.eq.s32.totalorder %s1608_s9, 0 }
  0x17   : > { %p190_p8 = scmp.eq.s32.totalorder %s1151_s10, 1  ;;  %p1152_p10 = scmp.ge.s32.totalorder %s1528_s8, 1 }
  0x18   : > { %p1617_p9 = por %p1916_p6, %p50_p5  ;;  %p197_p12 = scmp.lt.s32.totalorder %s1528_s8, 3 }
  0x19   : > { %p1622_p11 = por %p190_p8, %p50_p5  ;;  %s1531_s14 = smov [#allocation7]  }
  0x1a   : > { %s1919_s11 = scalar_select %p1617_p9, 1, 0 }
  0x1b   : > { %s1920_s12 = scalar_select %p1622_p11, 1, 0 }
  0x1c   : > { %p1627_p13 = pnand %p1152_p10, %p197_p12  ;;  %s215_s15 = sshll.u32 %s1531_s14, 4  ;;  %s1631_s15 = int_to_ptr.vmem [resolvable:$true] %s215_s15 }
  0x1d   : > { %s1643_s17 = sadd.s32 1, %s1528_s8   ;;  %s37_s18 = sadd.s32 1, %s1524_s30 }
  0x1e   : > { %s1921_s13 = scalar_select %p1627_p13, 1, 0 }
  0x1f   : > { %p1302_p0 = pneg %p1627_p13  ;;  %s34_s19 = ssub.s32 %s1528_s8, %s1643_s17 }
  0x20   : > { %s1398_s22 = scalar_lea.hbm %s1913_s5, 256 }
  0x21   : > { %p1638_p2 = pnand %p1302_p0, %p1916_p6  ;;  %p1399_p3 = scmp.ne.s32.totalorder %s1913_s5, %s1398_s22 }
  0x22   : > { %p1405_p10 = scmp.lt.u32.totalorder %s1398_s22, %s1913_s5 }
  0x23   : > { %p1400_p4 = pneg %p1638_p2 }
  0x25   : > { %p1401_p5 = pnand %p1400_p4, %p1399_p3 }
  0x27   : > { %p1402_p8 = pneg %p1401_p5 }
  0x29   : > { %p1407_p12 = pnand %p1405_p10, %p1402_p8 }
  0x2b   : > { %1410 = shalt.err (!%p1407_p12)
}
  0x2c   : > { %s1411_s27 = scalar_lea.vmem %s1631_s15, 256  ;;  %p1419_p7 = scmp.lt.s32.totalorder %s1631_s15, %s1631_s15 }
  0x2d   : > { %p1412_p0 = scmp.ne.s32.totalorder %s1631_s15, %s1411_s27  ;;  %p1420_p11 = scmp.lt.s32.totalorder %s1411_s27, %s1411_s27 }
  0x2f   : > { %p1414_p1 = pnand %p1412_p0, %p1400_p4  ;;  %p1421_p9 = por %p1420_p11, %p1419_p7 }
  0x31   : > { %p1415_p6 = pneg %p1414_p1 }
  0x33   : > { %p1422_p13 = pnand %p1421_p9, %p1415_p6 }
  0x35   : > { %1425 = shalt.err (!%p1422_p13)
}
  0x36   : > { %s1532_s28 = smov 64   ;;  %s1533_s10 = smov 4  }
  0x37   : > { %1305 = dma.hbm_to_vmem [thread:$0]  (!%p1638_p2), %s1913_s5, 256, %s1631_s15, [#allocation8], %s1532_s28, %s1532_s28, %s1533_s10  }
  0x38   : > { %p35_p7 = scmp.eq.s32.totalorder %s34_s19, 0  ;;  %p44_p6 = scmp.ne.s32.totalorder %s1524_s30, %s1520_s0 }
  0x39   : > { %p45_p9 = scmp.eq.s32.totalorder %s1528_s8, 0  ;;  %p1315_p11 = scmp.lt.s32.totalorder %s1528_s8, 2 }
  0x3a   : > { %s1674_s21 = scalar_select %p35_p7, %s1524_s30, %s37_s18  }
  0x3b   : > { %p46_p13 = por %p45_p9, %p44_p6  ;;  %p1923_p1 = scmp.eq.s32.totalorder %s1608_s9, 1 }
  0x3c   : > { %s232_s23 = sand.u32 1, %s1524_s30   ;;  %s1156_s24 = sshll.u32 %s1528_s8, 6 }
  0x3d   : > { %p1678_p3 = por %p1923_p1, %p44_p6  ;;  %s1155_s25 = sshll.u32 %s232_s23, 2 }
  0x3e   : > { %s1687_s27 = scalar_lea.hbm %s1909_s1, %s1156_s24  ;;  %s236_s15 = scalar_lea.vmem [#allocation4], %s1155_s25 }
  0x3f   : > { %s243_s18 = sshll.u32 %s236_s15, 4  ;;  %p1689_p2 = pnand %p1315_p11, %p46_p13  ;;  %s1693_s18 = int_to_ptr.vmem [resolvable:$true] %s243_s18 }
  0x40   : > { %s233_s28 = scalar_lea.sflag [#allocation5], %s232_s23  ;;  %s1426_s10 = scalar_lea.hbm %s1687_s27, 64 }
  0x41   : > { %p1427_p4 = scmp.ne.s32.totalorder %s1687_s27, %s1426_s10  ;;  %p1428_p5 = pneg %p1689_p2 }
  0x42   : > { %s1431_s24 = scalar_lea.hbm %s1909_s1, 128  ;;  %p1432_p12 = scmp.lt.u32.totalorder %s1687_s27, %s1909_s1 }
  0x43   : > { %p1429_p8 = pnand %p1428_p5, %p1427_p4  ;;  %p1433_p0 = scmp.lt.u32.totalorder %s1431_s24, %s1426_s10 }
  0x44   : > { %p1435_p6 = scmp.lt.u32.totalorder %s1426_s10, %s1687_s27 }
  0x45   : > { %p1430_p10 = pneg %p1429_p8  ;;  %p1434_p7 = por %p1433_p0, %p1432_p12 }
  0x47   : > { %p1436_p9 = por %p1435_p6, %p1434_p7 }
  0x49   : > { %p1437_p11 = pnand %p1436_p9, %p1430_p10 }
  0x4b   : > { %1440 = shalt.err (!%p1437_p11)
}
  0x4c   : > { %s1441_s23 = scalar_lea.vmem %s1693_s18, 64  ;;  %s1534_s26 = smov [#allocation4]  }
  0x4d   : > { %p1442_p13 = scmp.ne.s32.totalorder %s1693_s18, %s1441_s23  ;;  %s1446_s15 = sshll.u32 %s1534_s26, 4  ;;  %s1447_s15 = int_to_ptr.vmem [resolvable:$false] %s1446_s15 }
  0x4e   : > { %s1448_s14 = scalar_lea.vmem %s1447_s15, 128  ;;  %p1449_p8 = scmp.lt.s32.totalorder %s1693_s18, %s1447_s15 }
  0x4f   : > { %p1444_p1 = pnand %p1442_p13, %p1428_p5  ;;  %p1450_p12 = scmp.lt.s32.totalorder %s1448_s14, %s1441_s23 }
  0x51   : > { %p1445_p4 = pneg %p1444_p1  ;;  %p1451_p0 = por %p1450_p12, %p1449_p8 }
  0x53   : > { %p1452_p7 = pnand %p1451_p0, %p1445_p4 }
  0x55   : > { %1455 = shalt.err (!%p1452_p7)
}
  0x56   : > { %1309 = dma.hbm_to_vmem [thread:$0]  (!%p1689_p2), %s1687_s27, 64, %s1693_s18, %s233_s28  }
  0x57   : > { %p1926_p10 = scmp.ne.s32.totalorder %s1921_s13, 0 }
  0x58   : > { %s1723_s10 = sand.u32 (!%p1926_p10), 1, %s1520_s0   ;;  %p1927_p5 = scmp.ne.s32.totalorder (!%p1926_p10), %s1919_s11, 0 }
  0x59   : > { %259 = sbr.rel (%p1926_p10) target bundleno = 1543 (0x607), region = 44  ;;  %s1158_s20 = sshll.u32 (!%p1926_p10), %s1723_s10, 2 }
  0x5a   : > { %s262_s24 = scalar_lea.sflag (!%p1926_p10), [#allocation5], %s1723_s10  ;;  %s265_s25 = scalar_lea.vmem (!%p1926_p10), [#allocation4], %s1158_s20 }
  0x60   : > { %1503 = dma.done.wait (%p1927_p5), %s262_s24, 64  }
  0x61   : > { %1505 = vsyncadd (%p1927_p5), %s262_s24, 4294967232  ;;  %p1928_p2 = scmp.eq.s32.totalorder %s1608_s9, 0 }
  0x63   : > { %1507 = dma.done.wait (%p1928_p2), [#allocation8], 256   ;;  %p1929_p6 = pmov %p1928_p2 }
  0x64   : > { %p302_p9 = scmp.lt.s32.totalorder %s1608_s9, 1  ;;  %v1535_v0 = vmov 0.0   ;;  %vm1536_vm0 = vmmov 0   ;;  %v1362_v1 = vld [vmem:[%s1911_s3] sm:$0xff]   ;;  %v1364_v3 = vld [vmem:[%s1911_s3 + $0x8] sm:$0xff]   ;;  %vm328_vm1 = vcmask 261120   ;;  %v718_v43 = vlaneseq }
  0x65   : > { %1509 = vsyncadd (%p1929_p6), [#allocation8], 4294967040  ;;  %1214 = vmatprep.subr.bf16.mxu0 %v1535_v0  ;;  %1222 = vmatprep.subr.bf16.mxu1 %v1535_v0  ;;  %v1363_v2 = vld [vmem:[%s1912_s4] sm:$0xff]   ;;  %v1365_v4 = vld [vmem:[%s1912_s4 + $0x8] sm:$0xff]   ;;  %vm529_vm2 = vcmask 64512   ;;  %s1539_s27 = smov 112  }
  0x66   : > { %1218 = vmatprep.mubr.msk.bf16.mxu0 %vm1536_vm0, %v1535_v0  ;;  %1226 = vmatprep.mubr.msk.bf16.mxu1 %vm1536_vm0, %v1535_v0  ;;  %s303_s11 = scalar_select %p302_p9, %s1608_s9, 1  ;;  %v308_v5 = vld [vmem:[%s265_s25] sm:$0xf]  ;;  %v1366_v9 = vld [vmem:[#allocation7] sm:$0xff]   ;;  %v1367_v10 = vld [vmem:[#allocation7 + $0x8] sm:$0xff]   ;;  %vm781_vm3 = vcmask 1042432  }
  0x67   : > { %1215 = vmatpush3.bf16.msra.mxu0 %v1362_v1  ;;  %1223 = vmatpush3.bf16.msra.mxu1 %v1363_v2  ;;  %v309_v7 = vpack.c.bf16 %v308_v5, %v308_v5  ;;  %s1537_s25 = smov 120   ;;  %s307_s18 = sld [smem:[#allocation3 + %s1608_s9]]  ;;  %v719_v44 = vand.u32 127, %v718_v43  ;;  %vm728_vm5 = vcmask 44032   ;;  %vm777_vm6 = vcmask 48128  }
  0x68   : > { %s1161_s13 = sshll.u32 %s303_s11, 3  ;;  %1216 = vmatprep.subr.bf16.mxu0 %v1535_v0  ;;  %1224 = vmatprep.subr.bf16.mxu1 %v1535_v0  ;;  %s1541_s15 = smov 16   ;;  %vm979_vm7 = vcmask 130048   ;;  %vm982_vm8 = vcmask 195584   ;;  %vm1043_vm9 = vcmask 257024  }
  0x69   : > { %s305_s26 = scalar_lea.vmem %s1910_s2, %s1161_s13  ;;  %s1538_s13 = smov 104  }
  0x6a   : > { %v310_v6 = vld [vmem:[%s305_s26] sm:$0x3f]  ;;  %s1540_s26 = smov 8   ;;  %s1542_s14 = smov 24  }
  0x6b   : > { %1217 = vmatpush3.bf16.msra.mxu0 %v1364_v3  ;;  %v311_v8 = vpack.c.bf16 %v310_v6, %v310_v6  ;;  %1225 = vmatpush3.bf16.msra.mxu1 %v1365_v4  ;;  %s1183_s24 = sshll.u32 %s1608_s9, 6  ;;  %s301_s11 = scalar_lea.vmem [#allocation9], %s1158_s20 }
  0x6c   : > { %1230 = vmatprep.subr.bf16.mxu0 %v1535_v0  ;;  %1238 = vmatprep.subr.bf16.mxu1 %v1535_v0  ;;  %s1046_s19 = scalar_lea.sflag [#allocation6], %s1723_s10  ;;  %s1543_s20 = smov [#allocation9]  }
  0x6d   : > { %v720_v45 = vstv %s307_s18  ;;  %s1864_s18 = scalar_lea.hbm %s1915_s7, %s1183_s24  ;;  %s1460_s28 = sshll.u32 %s1543_s20, 4  ;;  %s1461_s28 = int_to_ptr.vmem [resolvable:$false] %s1460_s28 }
  0x6e   : > { %1219 = vmatmul.mubr.msk.bf16.vlgmr.msra.gmra.mrb[0].mxu0 %vm328_vm1, %v309_v7  ;;  %1227 = vmatmul.mubr.msk.bf16.vlgmr.msra.gmra.mrb[0].mxu1 %vm328_vm1, %v311_v8  ;;  %vm1808_vm4 = vcmp.lt.s32.totalorder %v719_v44, %v720_v45  ;;  %s1462_s16 = scalar_lea.vmem %s1461_s28, 128 }
  0x6f   : > { %1234 = vmatprep.mubr.msk.bf16.mxu0 %vm1536_vm0, %v1535_v0  ;;  %1240 = vmatprep.mubr.msk.bf16.mxu1 %vm1536_vm0, %v1535_v0 }
  0x70   : > { %1231 = vmatpush3.bf16.msra.mxu0 %v1366_v9 }
  0x71   : > { %1232 = vmatprep.subr.bf16.mxu0 %v1535_v0 }
  0x74   : > { %1233 = vmatpush3.bf16.msra.mxu0 %v1367_v10 }
  0x75   : > { %1244 = vmatprep.subr.bf16.mxu0 %v1535_v0 }
  0x77   : > { %1235 = vmatmul.mubr.msk.bf16.vlgmr.msra.gmra.mrb[4].mxu0 %vm328_vm1, %v311_v8 }
  0x78   : > { %1246 = vmatprep.mubr.msk.bf16.mxu0 %vm1536_vm0, %v1535_v0 }
 0x141   : > { %v366_v11 = vpop.f32.mrb[0].mxu0  ;;  %v425_v12 = vpop.f32.mrb[0].mxu1 }
 0x142   : > { %488 = vrot.lane.b32.xlu1 %v366_v11, %s1537_s25  ;;  %v1220_v13 = vpop.f32.mrb[1].mxu0  ;;  %502 = vrot.lane.b32.xlu0 %v425_v12, %s1537_s25  ;;  %v1228_v14 = vpop.f32.mrb[1].mxu1  ;;  %v511_v16 = vpack.c.bf16 %v425_v12, %v425_v12  ;;  %v497_v21 = vpack.c.bf16 %v366_v11, %v366_v11 }
 0x143   : > { %v369_v15 = vpop.f32.mrb[2].mxu0  ;;  %v428_v17 = vpop.f32.mrb[2].mxu1 }
 0x144   : > { %v1221_v18 = vpop.f32.mrb[3].mxu0  ;;  %v1229_v19 = vpop.f32.mrb[3].mxu1  ;;  %v534_v20 = vsel %vm529_vm2, %v511_v16, 0 }
 0x145   : > { %1239 = vmatpush3.bf16.xpose.msra.mxu1 %v534_v20 }
 0x146   : > { %508 = vrot.lane.b32.xlu1 %v425_v12, %s1538_s13  ;;  %505 = vrot.lane.b32.xlu0 %v425_v12, %s1539_s27 }
 0x147   : > { %1250 = vmatprep.subr.bf16.mxu1 %v1535_v0 }
 0x14a   : > { %494 = vrot.lane.b32.xlu1 %v366_v11, %s1538_s13  ;;  %491 = vrot.lane.b32.xlu0 %v366_v11, %s1539_s27  ;;  %v1786_v22 = vpop.f32.mrb[4].mxu0 }
 0x14b   : > { %v1236_v23 = vpop.f32.mrb[5].mxu0  ;;  %v525_v36 = vpack.c.bf16 %v1786_v22, %v1786_v22 }
 0x14c   : > { %1241 = vmatmul.mubr.msk.bf16.vlgmr.msra.gmra.mrb[4].mxu1 %vm529_vm2, %v497_v21  ;;  %v484_v24 = vpop.f32.mrb[6].mxu0 }
 0x14d   : > { %1252 = vmatprep.mubr.msk.bf16.mxu1 %vm1536_vm0, %v1535_v0  ;;  %v1237_v25 = vpop.f32.mrb[7].mxu0  ;;  %v783_v40 = vsel %vm781_vm3, %v525_v36, 0 }
 0x1b4   : > { %v489_v26 = vpop.permute.xlu1 %488  ;;  %v503_v27 = vpop.permute.xlu0 %502 }
 0x1b5   : > { %v512_v28 = vpack.c.bf16 %v503_v27, %v503_v27  ;;  %v498_v35 = vpack.c.bf16 %v489_v26, %v489_v26 }
 0x1b7   : > { %v580_v29 = vsel %vm529_vm2, %v512_v28, 0 }
 0x1b8   : > { %v506_v30 = vpop.permute.xlu0 %505  ;;  %1245 = vmatpush3.bf16.xpose.msra.mxu0 %v580_v29  ;;  %v509_v31 = vpop.permute.xlu1 %508 }
 0x1b9   : > { %v513_v32 = vpack.c.bf16 %v506_v30, %v506_v30  ;;  %1256 = vmatprep.subr.bf16.mxu0 %v1535_v0  ;;  %v514_v34 = vpack.c.bf16 %v509_v31, %v509_v31 }
 0x1bb   : > { %v626_v33 = vsel %vm529_vm2, %v513_v32, 0  ;;  %v672_v38 = vsel %vm529_vm2, %v514_v34, 0 }
 0x1bc   : > { %1251 = vmatpush3.bf16.xpose.msra.mxu1 %v626_v33  ;;  %v492_v37 = vpop.permute.xlu0 %491  ;;  %v495_v41 = vpop.permute.xlu1 %494 }
 0x1bd   : > { %1262 = vmatprep.subr.bf16.mxu1 %v1535_v0  ;;  %v499_v39 = vpack.c.bf16 %v492_v37, %v492_v37  ;;  %v500_v42 = vpack.c.bf16 %v495_v41, %v495_v41 }
 0x1bf   : > { %1247 = vmatmul.mubr.msk.bf16.vlgmr.msra.gmra.mrb[8].mxu0 %vm529_vm2, %v498_v35 }
 0x1c0   : > { %1257 = vmatpush3.bf16.xpose.msra.mxu0 %v672_v38  ;;  %1258 = vmatprep.mubr.msk.bf16.mxu0 %vm1536_vm0, %v1535_v0 }
 0x1c1   : > { %1268 = vmatprep.subr.bf16.mxu0 %v1535_v0 }
 0x1c3   : > { %1253 = vmatmul.mubr.msk.bf16.vlgmr.msra.gmra.mrb[8].mxu1 %vm529_vm2, %v499_v39 }
 0x1c4   : > { %1263 = vmatpush3.bf16.msra.mxu1 %v783_v40  ;;  %1264 = vmatprep.mubr.msk.bf16.mxu1 %vm1536_vm0, %v1535_v0 }
 0x1c5   : > { %1274 = vmatprep.subr.bf16.mxu1 %v1535_v0 }
 0x1c7   : > { %1259 = vmatmul.mubr.msk.bf16.vlgmr.msra.gmra.mrb[12].mxu0 %vm529_vm2, %v500_v42 }
 0x1c8   : > { %1270 = vmatprep.mubr.msk.bf16.mxu0 %vm1536_vm0, %v1535_v0 }
 0x21f   : > { %v570_v46 = vpop.f32.mrb[4].mxu1 }
 0x220   : > { %v714_v48 = vmul.f32 0.35355338, %v570_v46  ;;  %v1242_v49 = vpop.f32.mrb[5].mxu1 }
 0x221   : > { %v573_v50 = vpop.f32.mrb[6].mxu1 }
 0x222   : > { %v1243_v51 = vpop.f32.mrb[7].mxu1  ;;  %v724_v52 = vsel %vm1808_vm4, %v714_v48, -1000000.0 }
 0x223   : > { %v729_v53 = vsel %vm728_vm5, %v724_v52, -inf }
 0x224   : > { %730 = vmax.xlane.f32.xlu0 %v729_v53 }
 0x292   : > { %v616_v54 = vpop.f32.mrb[8].mxu0 }
 0x293   : > { %v715_v55 = vmul.f32 0.35355338, %v616_v54  ;;  %v1248_v56 = vpop.f32.mrb[9].mxu0 }
 0x294   : > { %v619_v57 = vpop.f32.mrb[10].mxu0 }
 0x295   : > { %v1249_v58 = vpop.f32.mrb[11].mxu0  ;;  %v725_v59 = vsel %vm1808_vm4, %v715_v55, -1000000.0 }
 0x296   : > { %v662_v60 = vpop.f32.mrb[8].mxu1  ;;  %v732_v61 = vsel %vm728_vm5, %v725_v59, -inf }
 0x297   : > { %v716_v62 = vmul.f32 0.35355338, %v662_v60  ;;  %v1254_v63 = vpop.f32.mrb[9].mxu1  ;;  %733 = vmax.xlane.f32.xlu1 %v732_v61  ;;  %v1368_v61 = vld [vmem:[%s1914_s6] sm:$0xff]  }
 0x298   : > { %v665_v1 = vpop.f32.mrb[10].mxu1 }
 0x299   : > { %v1255_v2 = vpop.f32.mrb[11].mxu1  ;;  %v726_v3 = vsel %vm1808_vm4, %v716_v62, -1000000.0  ;;  %v1369_v62 = vld [vmem:[%s1914_s6 + $0x8] sm:$0xff]  }
 0x29a   : > { %v708_v4 = vpop.f32.mrb[12].mxu0  ;;  %v735_v5 = vsel %vm728_vm5, %v726_v3, -inf }
 0x29b   : > { %v717_v6 = vmul.f32 0.35355338, %v708_v4  ;;  %v1260_v7 = vpop.f32.mrb[13].mxu0  ;;  %736 = vmax.xlane.f32.xlu0 %v735_v5 }
 0x29c   : > { %v711_v8 = vpop.f32.mrb[14].mxu0 }
 0x29d   : > { %v1261_v9 = vpop.f32.mrb[15].mxu0  ;;  %v727_v10 = vsel %vm1808_vm4, %v717_v6, -1000000.0 }
 0x29e   : > { %v738_v11 = vsel %vm728_vm5, %v727_v10, -inf }
 0x29f   : > { %739 = vmax.xlane.f32.xlu0 %v738_v11 }
 0x2a8   : > { %516 = vrot.lane.b32.xlu1 %v1786_v22, %s1537_s25  ;;  %s1059_s25 = sshll.u32 %s301_s11, 4  ;;  %s1866_s25 = int_to_ptr.vmem [resolvable:$true] %s1059_s25 }
 0x2a9   : > { %s1456_s9 = scalar_lea.vmem %s1866_s25, 64  ;;  %p1463_p4 = scmp.lt.s32.totalorder %s1866_s25, %s1461_s28 }
 0x2aa   : > { %p1457_p11 = scmp.ne.s32.totalorder %s1866_s25, %s1456_s9  ;;  %p1464_p8 = scmp.lt.s32.totalorder %s1462_s16, %s1456_s9 }
 0x2ac   : > { %p1458_p13 = pnand %p1457_p11, %p1678_p3  ;;  %p1465_p12 = por %p1464_p8, %p1463_p4 }
 0x2ae   : > { %p1459_p1 = pneg %p1458_p13 }
 0x2b0   : > { %p1466_p0 = pnand %p1465_p12, %p1459_p1 }
 0x2b1   : > { %v731_v12 = vpop.xlane.xlu0 %730 }
 0x2b2   : > { %v741_v13 = vsub.f32 %v724_v52, %v731_v12 }
 0x2b4   : > { %v745_v14 = vmul.f32 1.442695, %v741_v13 }
 0x2b6   : > { %1370 = vpow2.f32 %v745_v14 }
 0x2c0   : > { %v1371_v15 = vpop.eup %1370 }
 0x2c1   : > { %v753_v16 = vsel %vm728_vm5, %v1371_v15, 0.0 }
 0x2cc   : > { %754 = vadd.xlane.f32.xlu1 %v753_v16 }
 0x324   : > { %v734_v17 = vpop.xlane.xlu1 %733 }
 0x325   : > { %v742_v18 = vsub.f32 %v725_v59, %v734_v17 }
 0x327   : > { %v747_v19 = vmul.f32 1.442695, %v742_v18 }
 0x328   : > { %v517_v20 = vpop.permute.xlu1 %516  ;;  %v737_v21 = vpop.xlane.xlu0 %736 }
 0x329   : > { %1372 = vpow2.f32 %v747_v19  ;;  %v526_v23 = vpack.c.bf16 %v517_v20, %v517_v20  ;;  %v743_v24 = vsub.f32 %v726_v3, %v737_v21 }
 0x32b   : > { %v829_v25 = vsel %vm781_vm3, %v526_v23, 0  ;;  %v749_v26 = vmul.f32 1.442695, %v743_v24 }
 0x32c   : > { %1269 = vmatpush3.bf16.msra.mxu0 %v829_v25  ;;  %v740_v27 = vpop.xlane.xlu0 %739 }
 0x32d   : > { %1374 = vpow2.f32 %v749_v26  ;;  %v744_v28 = vsub.f32 %v727_v10, %v740_v27  ;;  %1280 = vmatprep.subr.bf16.mxu0 %v1535_v0 }
 0x32f   : > { %v751_v29 = vmul.f32 1.442695, %v744_v28 }
 0x331   : > { %1376 = vpow2.f32 %v751_v29 }
 0x333   : > { %v1373_v30 = vpop.eup %1372 }
 0x334   : > { %v756_v31 = vsel %vm728_vm5, %v1373_v30, 0.0 }
 0x335   : > { %757 = vadd.xlane.f32.xlu0 %v756_v31 }
 0x337   : > { %v1375_v32 = vpop.eup %1374 }
 0x338   : > { %v759_v33 = vsel %vm728_vm5, %v1375_v32, 0.0 }
 0x339   : > { %760 = vadd.xlane.f32.xlu1 %v759_v33 }
 0x33b   : > { %v1377_v34 = vpop.eup %1376 }
 0x33c   : > { %v762_v35 = vsel %vm728_vm5, %v1377_v34, 0.0 }
 0x33d   : > { %763 = vadd.xlane.f32.xlu0 %v762_v35 }
 0x34a   : > { %522 = vrot.lane.b32.xlu1 %v1786_v22, %s1538_s13 }
 0x353   : > { %519 = vrot.lane.b32.xlu0 %v1786_v22, %s1539_s27 }
 0x359   : > { %v755_v36 = vpop.xlane.xlu1 %754 }
 0x35a   : > { %1378 = vrcp.f32 %v755_v36 }
 0x364   : > { %v1379_v37 = vpop.eup %1378 }
 0x365   : > { %v769_v38 = vmul.f32 %v1379_v37, %v1371_v15 }
 0x367   : > { %v773_v39 = vpack.c.bf16 %v769_v38, %v769_v38 }
 0x369   : > { %1265 = vmatmul.mubr.msk.bf16.vlgmr.msra.gmra.mrb[12].mxu1 %vm777_vm6, %v773_v39 }
 0x36a   : > { %1276 = vmatprep.mubr.msk.bf16.mxu1 %vm1536_vm0, %v1535_v0 }
 0x3c2   : > { %v758_v40 = vpop.xlane.xlu0 %757 }
 0x3c3   : > { %1380 = vrcp.f32 %v758_v40 }
 0x3c6   : > { %v761_v41 = vpop.xlane.xlu1 %760 }
 0x3c7   : > { %1382 = vrcp.f32 %v761_v41 }
 0x3ca   : > { %v764_v42 = vpop.xlane.xlu0 %763  ;;  %v523_v43 = vpop.permute.xlu1 %522 }
 0x3cb   : > { %1384 = vrcp.f32 %v764_v42  ;;  %v528_v45 = vpack.c.bf16 %v523_v43, %v523_v43 }
 0x3cd   : > { %v1381_v44 = vpop.eup %1380  ;;  %v921_v52 = vsel %vm781_vm3, %v528_v45, 0 }
 0x3ce   : > { %v770_v22 = vmul.f32 %v1381_v44, %v1373_v30  ;;  %v520_v46 = vpop.permute.xlu0 %519 }
 0x3cf   : > { %v527_v47 = vpack.c.bf16 %v520_v46, %v520_v46 }
 0x3d0   : > { %v774_v48 = vpack.c.bf16 %v770_v22, %v770_v22 }
 0x3d1   : > { %v1383_v49 = vpop.eup %1382  ;;  %v875_v50 = vsel %vm781_vm3, %v527_v47, 0 }
 0x3d2   : > { %v771_v51 = vmul.f32 %v1383_v49, %v1375_v32  ;;  %1271 = vmatmul.mubr.msk.bf16.vlgmr.msra.gmra.mrb[16].mxu0 %vm777_vm6, %v774_v48  ;;  %1275 = vmatpush3.bf16.msra.mxu1 %v875_v50 }
 0x3d3   : > { %1281 = vmatpush3.bf16.msra.mxu0 %v921_v52  ;;  %1282 = vmatprep.mubr.msk.bf16.mxu0 %vm1536_vm0, %v1535_v0 }
 0x3d4   : > { %v775_v53 = vpack.c.bf16 %v771_v51, %v771_v51  ;;  %1286 = vmatprep.subr.bf16.mxu1 %v1535_v0 }
 0x3d5   : > { %v1385_v54 = vpop.eup %1384 }
 0x3d6   : > { %v772_v55 = vmul.f32 %v1385_v54, %v1377_v34  ;;  %1277 = vmatmul.mubr.msk.bf16.vlgmr.msra.gmra.mrb[16].mxu1 %vm777_vm6, %v775_v53 }
 0x3d7   : > { %1290 = vmatprep.mubr.msk.bf16.mxu1 %vm1536_vm0, %v1535_v0  ;;  %1287 = vmatpush3.bf16.msra.mxu1 %v1368_v61 }
 0x3d8   : > { %v776_v56 = vpack.c.bf16 %v772_v55, %v772_v55  ;;  %1288 = vmatprep.subr.bf16.mxu1 %v1535_v0 }
 0x3da   : > { %1283 = vmatmul.mubr.msk.bf16.vlgmr.msra.gmra.mrb[20].mxu0 %vm777_vm6, %v776_v56 }
 0x3db   : > { %1289 = vmatpush3.bf16.msra.mxu1 %v1369_v62 }
 0x43c   : > { %v819_v57 = vpop.f32.mrb[12].mxu1 }
 0x43d   : > { %v1266_v58 = vpop.f32.mrb[13].mxu1  ;;  %v963_v15 = vpack.c.bf16 %v819_v57, %v819_v57 }
 0x43e   : > { %v822_v59 = vpop.f32.mrb[14].mxu1 }
 0x43f   : > { %v1267_v60 = vpop.f32.mrb[15].mxu1 }
 0x4a5   : > { %v865_v63 = vpop.f32.mrb[16].mxu0 }
 0x4a6   : > { %v964_v1 = vpack.c.bf16 %v865_v63, %v865_v63  ;;  %v1272_v2 = vpop.f32.mrb[17].mxu0 }
 0x4a7   : > { %v868_v3 = vpop.f32.mrb[18].mxu0 }
 0x4a8   : > { %968 = vrot.lane.b32.xlu1 %v964_v1, %s1540_s26  ;;  %v1273_v4 = vpop.f32.mrb[19].mxu0 }
 0x4a9   : > { %v911_v5 = vpop.f32.mrb[16].mxu1 }
 0x4aa   : > { %v965_v6 = vpack.c.bf16 %v911_v5, %v911_v5  ;;  %v1278_v7 = vpop.f32.mrb[17].mxu1 }
 0x4ab   : > { %v914_v8 = vpop.f32.mrb[18].mxu1 }
 0x4ac   : > { %971 = vrot.lane.b32.xlu0 %v965_v6, %s1541_s15  ;;  %v1279_v9 = vpop.f32.mrb[19].mxu1 }
 0x4ad   : > { %v957_v0 = vpop.f32.mrb[20].mxu0 }
 0x4ae   : > { %v966_v10 = vpack.c.bf16 %v957_v0, %v957_v0  ;;  %v1284_v11 = vpop.f32.mrb[21].mxu0 }
 0x4af   : > { %v960_v12 = vpop.f32.mrb[22].mxu0 }
 0x4b0   : > { %974 = vrot.lane.b32.xlu1 %v966_v10, %s1542_s14  ;;  %v1285_v13 = vpop.f32.mrb[23].mxu0 }
 0x51a   : > { %v969_v14 = vpop.permute.xlu1 %968 }
 0x51b   : > { %v978_v17 = vsel %vm529_vm2, %v963_v15, %v969_v14 }
 0x51e   : > { %v972_v16 = vpop.permute.xlu0 %971 }
 0x51f   : > { %v981_v18 = vsel %vm979_vm7, %v978_v17, %v972_v16 }
 0x522   : > { %v975_v19 = vpop.permute.xlu1 %974 }
 0x523   : > { %v984_v20 = vsel %vm982_vm8, %v981_v18, %v975_v19 }
 0x524   : > { %1291 = vmatmul.mubr.msk.bf16.vlgmr.msra.gmra.mrb[20].mxu1 %vm328_vm1, %v984_v20 }
 0x5f7   : > { %v1037_v21 = vpop.f32.mrb[20].mxu1 }
 0x5f8   : > { %1044 = vst.msk [vmem:[%s301_s11] sm:$0xf] %vm1043_vm9, %v1037_v21  ;;  %v1292_v23 = vpop.f32.mrb[21].mxu1 }
 0x5f9   : > { %v1040_v24 = vpop.f32.mrb[22].mxu1 }
 0x5fa   : > { %1469 = shalt.err (!%p1466_p0)
}
 0x5fb   : > { %s1470_s10 = scalar_lea.hbm %s1864_s18, 64  ;;  %s1474_s15 = scalar_lea.hbm %s1915_s7, 128 }
 0x5fc   : > { %p1471_p7 = scmp.ne.s32.totalorder %s1864_s18, %s1470_s10  ;;  %p1475_p2 = scmp.lt.u32.totalorder %s1864_s18, %s1915_s7 }
 0x5fd   : > { %p1476_p6 = scmp.lt.u32.totalorder %s1474_s15, %s1470_s10  ;;  %p1478_p11 = scmp.lt.u32.totalorder %s1470_s10, %s1864_s18 }
 0x5fe   : > { %p1472_p10 = pnand %p1471_p7, %p1678_p3 }
 0x5ff   : > { %p1477_p9 = por %p1476_p6, %p1475_p2 }
 0x600   : > { %p1473_p5 = pneg %p1472_p10 }
 0x601   : > { %p1479_p13 = por %p1478_p11, %p1477_p9 }
 0x603   : > { %p1480_p1 = pnand %p1479_p13, %p1473_p5 }
 0x605   : > { %1483 = shalt.err (!%p1480_p1)
}
 0x606   : > { %1300 = dma.vmem_to_hbm [thread:$0]  (%p1678_p3), %s1866_s25, 64, %s1864_s18, %s1046_s19   ;;  %v1293_v25 = vpop.f32.mrb[23].mxu1 }
 0x607 PF: > { %s1071_s11 = sand.u32 1, %s1516_s29   ;;  %p1932_p4 = scmp.ne.s32.totalorder %s1920_s12, 0 }
 0x608   : > { %p1933_p8 = scmp.ge.s32.totalorder %s1528_s8, 2  ;;  %s1072_s13 = scalar_lea.sflag [#allocation6], %s1071_s11 }
 0x60a   : > { %p1311_p12 = pnand %p1933_p8, %p1932_p4 }
 0x60c   : > { %1511 = dma.done.wait (!%p1311_p12), %s1072_s13, 64  }
 0x60d   : > { %1513 = vsyncadd (!%p1311_p12), %s1072_s13, 4294967232  ;;  %p27_p0 = scmp.ge.s32.totalorder %s1643_s17, 4   ;;  %s1934_s29 = smov %s1520_s0 }
 0x60e   : > { %s1935_s0 = smov %s1524_s30  ;;  %s1936_s30 = smov %s1674_s21 }
 0x60f   : > { %s1937_s8 = smov %s1643_s17  ;;  %29 = sbr.rel (!%p27_p0) target bundleno = 21 (0x15), region = 96 }
 0x616   :  { %1077 = vsyncpa [#allocation5], 1 }
 0x617   :  { %1079 = vsyncpa [#allocation5 + $0x1], 1 }
 0x618   :  { %1080 = vsyncpa [#allocation8], 1 }
 0x619   :  { %1081 = vsyncpa [#allocation6], 1 }
 0x61a   :  { %1083 = vsyncpa [#allocation6 + $0x1], 1 }

</bundles_post_ra>
